<compile_context>
chip_gen: v7x
topology: tpu7x:2x2x1
jax: 0.10.0
libtpu: 0.0.40
codegen_flags: <defaults>
</compile_context>

<pallas_src>
import functools

import jax
import jax.numpy as jnp
from jax.experimental import pallas as pl
from jax.experimental.pallas import tpu as pltpu

INPUT_SIZE = 128          # per-embedding feature size (module's self.input_size)
HIDDEN = 256              # first Linear output size
LANE = 128                # TPU lane width
TM_MAX = 2048             # max rows per grid step (fits default scoped VMEM everywhere)


def _round_up(x, m):
    return ((x + m - 1) // m) * m


def _mxu_is_256_deep():
    """True on chips with a 256-deep MXU (v6e / v7x); False on v5e and older."""
    try:
        kind = jax.devices()[0].device_kind.lower()
    except Exception:
        return True
    return not any(tag in kind for tag in ("v2", "v3", "v4", "v5"))


def _inverse_dynamics_kernel(x1_ref, x2_ref, w1_ref, b1_ref, w2_ref, b2_ref,
                             o_ref, *, fuse_k):
    # x1_ref : (TM, 128)  bf16  state embedding rows
    # x2_ref : (TM, 128)  bf16  next-state embedding rows
    # w1_ref : (256, 256) bf16  first-Linear weight, (in, out) layout
    # b1_ref : (1, 256)   f32
    # w2_ref : (256, A_pad) bf16 second-Linear weight, lane-padded, (in, out)
    # b2_ref : (1, A_pad) f32
    # o_ref  : (TM, A_pad) bf16 lane-dense logits block
    if fuse_k:
        # v6e / v7x: one K=256 pass through the 256-deep MXU (lane concat in VMEM).
        x = jnp.concatenate([x1_ref[...], x2_ref[...]], axis=-1)       # (TM, 256)
        h = jnp.dot(x, w1_ref[...], preferred_element_type=jnp.float32)
    else:
        # v5e: K=128 is the native MXU depth; split-K accumulation into f32.
        h = jnp.dot(x1_ref[...], w1_ref[:INPUT_SIZE, :],
                    preferred_element_type=jnp.float32)
        h = h + jnp.dot(x2_ref[...], w1_ref[INPUT_SIZE:, :],
                        preferred_element_type=jnp.float32)
    # Bias + ReLU in f32 (VPU), then bf16 only at the MXU input.
    h = jnp.maximum(h + b1_ref[...], 0.0)
    logits = jnp.dot(h.astype(jnp.bfloat16), w2_ref[...],
                     preferred_element_type=jnp.float32) + b2_ref[...]
    o_ref[...] = logits.astype(o_ref.dtype)


@functools.partial(jax.jit, static_argnames=("num_actions", "fuse_k"))
def _inverse_dynamics_pallas(state_embedding, next_state_embedding,
                             w1, b1, w2, b2, *, num_actions, fuse_k):
    T, B, D = state_embedding.shape
    assert D == INPUT_SIZE and next_state_embedding.shape == (T, B, D)
    M = T * B

    # Feature-last, row-flattened bf16 views (no HBM concat, no row padding).
    x1 = state_embedding.reshape(M, D).astype(jnp.bfloat16)
    x2 = next_state_embedding.reshape(M, D).astype(jnp.bfloat16)

    # bf16 weights; pad the logits dim to a full 128-lane width so every output
    # store is an unmasked 128-lane vst.  Biases stay f32 (f32 VPU add).
    A_pad = max(LANE, _round_up(num_actions, LANE))
    w1b = w1.astype(jnp.bfloat16)                                      # (256, 256)
    w2p = jnp.pad(w2, ((0, 0), (0, A_pad - num_actions))).astype(jnp.bfloat16)
    b2p = jnp.pad(b2, ((0, 0), (0, A_pad - num_actions)))              # (1, A_pad) f32

    # Row tile: multiple of 16 (bf16 sublane packing), large enough to amortize
    # the ~0.35 us/step pipeline overhead, small enough for default scoped VMEM.
    TM = min(TM_MAX, _round_up(M, 16))
    if M > 1024:
        # Ensure >= 2 balanced grid steps so the "parallel" axis can feed both
        # TensorCores on v7x (no-op for small M).
        TM = min(TM, _round_up((M + 1) // 2, 16))
    grid = (pl.cdiv(M, TM),)

    flops = 2 * M * (2 * D) * HIDDEN + 2 * M * HIDDEN * A_pad
    bytes_accessed = (2 * M * D * 2                          # x1 + x2 (bf16)
                      + (2 * D * HIDDEN + HIDDEN * A_pad) * 2  # weights (bf16)
                      + (HIDDEN + A_pad) * 4                   # biases (f32)
                      + M * A_pad * 2)                         # logits out (bf16)

    out = pl.pallas_call(
        functools.partial(_inverse_dynamics_kernel, fuse_k=fuse_k),
        out_shape=jax.ShapeDtypeStruct((M, A_pad), jnp.bfloat16),
        grid=grid,
        in_specs=[
            pl.BlockSpec((TM, D), lambda i: (i, 0)),              # x1 tile
            pl.BlockSpec((TM, D), lambda i: (i, 0)),              # x2 tile
            pl.BlockSpec((2 * D, HIDDEN), lambda i: (0, 0)),      # w1 (resident)
            pl.BlockSpec((1, HIDDEN), lambda i: (0, 0)),          # b1 (resident)
            pl.BlockSpec((HIDDEN, A_pad), lambda i: (0, 0)),      # w2 (resident)
            pl.BlockSpec((1, A_pad), lambda i: (0, 0)),           # b2 (resident)
        ],
        out_specs=pl.BlockSpec((TM, A_pad), lambda i: (i, 0)),
        compiler_params=pltpu.CompilerParams(
            dimension_semantics=("parallel",),
            vmem_limit_bytes=32 << 20),
        cost_estimate=pl.CostEstimate(
            flops=flops, transcendentals=0, bytes_accessed=bytes_accessed),
    )(x1, x2, w1b, b1, w2p, b2p)

    # Drop the lane padding, restore (T, B, num_actions) in f32.
    return out[:, :num_actions].astype(jnp.float32).reshape(T, B, num_actions)


def inverse_dynamics_forward(state_embedding, next_state_embedding,
                             w1, b1, w2, b2, *, num_actions):
    """state_embedding, next_state_embedding: (T, B, 128) -> logits (T, B, num_actions)."""
    return _inverse_dynamics_pallas(state_embedding, next_state_embedding,
                                    w1, b1, w2, b2, num_actions=num_actions,
                                    fuse_k=_mxu_is_256_deep())


def _orthogonal(key, shape, gain):
    """Deterministic orthogonal init matching nn.init.orthogonal_ semantics."""
    rows, cols = shape
    n = max(rows, cols)
    a = jax.random.normal(key, (n, n), dtype=jnp.float32)
    q, r = jnp.linalg.qr(a)
    q = q * jnp.sign(jnp.diag(r))[None, :]
    return gain * q[:rows, :cols]


def make_params(key, num_actions):
    k1, k2 = jax.random.split(key)
    relu_gain = float(jnp.sqrt(2.0))  # nn.init.calculate_gain('relu')
    # PyTorch Linear weight is (out, in); we store transposed (in, out) for the kernel.
    w1 = _orthogonal(k1, (HIDDEN, 2 * INPUT_SIZE), relu_gain).T      # (256, 256)
    b1 = jnp.zeros((1, HIDDEN), dtype=jnp.float32)
    w2 = _orthogonal(k2, (num_actions, HIDDEN), 1.0).T               # (256, A)
    b2 = jnp.zeros((1, num_actions), dtype=jnp.float32)
    return w1, b1, w2, b2


def _reference_forward(state_embedding, next_state_embedding, w1, b1, w2, b2):
    # Mirror the kernel's bf16 operand casts (with f32 accumulation) so the
    # correctness check stays tight; the logits themselves are left in f32 here.
    f32 = jnp.float32
    x = jnp.concatenate([state_embedding, next_state_embedding], axis=2)
    x = x.astype(jnp.bfloat16).astype(f32)
    w1f = w1.astype(jnp.bfloat16).astype(f32)
    w2f = w2.astype(jnp.bfloat16).astype(f32)
    h = jnp.maximum(x @ w1f + b1[0], 0.0)
    h = h.astype(jnp.bfloat16).astype(f32)
    return h @ w2f + b2[0]


if __name__ == "__main__":
    T, B = 8, 2
    num_actions = 6

    key = jax.random.PRNGKey(0)
    k_s, k_ns, k_p = jax.random.split(key, 3)
    state_embedding = jax.random.normal(k_s, (T, B, INPUT_SIZE), dtype=jnp.float32)
    next_state_embedding = jax.random.normal(k_ns, (T, B, INPUT_SIZE), dtype=jnp.float32)

    w1, b1, w2, b2 = make_params(k_p, num_actions)

    logits = inverse_dynamics_forward(state_embedding, next_state_embedding,
                                      w1, b1, w2, b2, num_actions=num_actions)
    logits = jax.block_until_ready(logits)

    ref = _reference_forward(state_embedding, next_state_embedding, w1, b1, w2, b2)
    assert logits.shape == (T, B, num_actions)
    assert logits.dtype == jnp.float32
    # bf16 matmul operands + bf16 logit store -> loosened tolerance vs f32 ref.
    assert jnp.allclose(logits, ref, atol=5e-2, rtol=2e-2)

    print("KERNEL_OK")
</pallas_src>

<mosaic_0001>
module attributes {stable_mosaic.version = 11 : i64} {
  func.func @_inverse_dynamics_kernel(%arg0: i32, %arg1: memref<16x128xbf16, #tpu.memory_space<vmem>>, %arg2: memref<16x128xbf16, #tpu.memory_space<vmem>>, %arg3: memref<256x256xbf16, #tpu.memory_space<vmem>>, %arg4: memref<1x256xf32, #tpu.memory_space<vmem>>, %arg5: memref<256x128xbf16, #tpu.memory_space<vmem>>, %arg6: memref<1x128xf32, #tpu.memory_space<vmem>>, %arg7: memref<16x128xbf16, #tpu.memory_space<vmem>>) attributes {dimension_semantics = [#tpu.dimension_semantics<parallel>], iteration_bounds = array<i64: 1>, scalar_prefetch = 0 : i64, scratch_operands = 0 : i64, tpu.core_type = #tpu.core_type<tc>, window_params = [{transform_indices = @transform_0, window_bounds = array<i64: 16, 128>}, {transform_indices = @transform_1, window_bounds = array<i64: 16, 128>}, {pipeline_mode = #tpu.pipeline_mode<synchronous>, transform_indices = @transform_2, window_bounds = array<i64: 256, 256>}, {pipeline_mode = #tpu.pipeline_mode<synchronous>, transform_indices = @transform_3, window_bounds = array<i64: 1, 256>}, {pipeline_mode = #tpu.pipeline_mode<synchronous>, transform_indices = @transform_4, window_bounds = array<i64: 256, 128>}, {pipeline_mode = #tpu.pipeline_mode<synchronous>, transform_indices = @transform_5, window_bounds = array<i64: 1, 128>}, {transform_indices = @transform_6, window_bounds = array<i64: 16, 128>}]} {
    %c0 = arith.constant 0 : index
    %c0_0 = arith.constant 0 : index
    %0 = vector.load %arg1[%c0, %c0_0] : memref<16x128xbf16, #tpu.memory_space<vmem>>, vector<16x128xbf16>
    %c0_1 = arith.constant 0 : index
    %c0_2 = arith.constant 0 : index
    %1 = vector.load %arg2[%c0_1, %c0_2] : memref<16x128xbf16, #tpu.memory_space<vmem>>, vector<16x128xbf16>
    %2 = tpu.concatenate %0, %1 in 1 : vector<16x128xbf16>, vector<16x128xbf16> -> vector<16x256xbf16>
    %c0_3 = arith.constant 0 : index
    %c0_4 = arith.constant 0 : index
    %3 = vector.load %arg3[%c0_3, %c0_4] : memref<256x256xbf16, #tpu.memory_space<vmem>>, vector<256x256xbf16>
    %cst = arith.constant dense<0.000000e+00> : vector<16x256xf32>
    %4 = tpu.matmul %2, %3, %cst {dimension_numbers = #tpu.dot_dimension_numbers<[1], [0], [0], [1], [0, 0, 1, 1], [], []>} : vector<16x256xbf16>, vector<256x256xbf16>, vector<16x256xf32> -> vector<16x256xf32>
    %c0_5 = arith.constant 0 : index
    %c0_6 = arith.constant 0 : index
    %5 = vector.load %arg4[%c0_5, %c0_6] : memref<1x256xf32, #tpu.memory_space<vmem>>, vector<1x256xf32>
    %6 = vector.broadcast %5 : vector<1x256xf32> to vector<16x256xf32>
    %7 = arith.addf %4, %6 : vector<16x256xf32>
    %cst_7 = arith.constant 0.000000e+00 : f32
    %8 = vector.broadcast %cst_7 : f32 to vector<16x256xf32>
    %9 = arith.maximumf %7, %8 : vector<16x256xf32>
    %10 = arith.truncf %9 : vector<16x256xf32> to vector<16x256xbf16>
    %c0_8 = arith.constant 0 : index
    %c0_9 = arith.constant 0 : index
    %11 = vector.load %arg5[%c0_8, %c0_9] : memref<256x128xbf16, #tpu.memory_space<vmem>>, vector<256x128xbf16>
    %cst_10 = arith.constant dense<0.000000e+00> : vector<16x128xf32>
    %12 = tpu.matmul %10, %11, %cst_10 {dimension_numbers = #tpu.dot_dimension_numbers<[1], [0], [0], [1], [0, 0, 1, 1], [], []>} : vector<16x256xbf16>, vector<256x128xbf16>, vector<16x128xf32> -> vector<16x128xf32>
    %c0_11 = arith.constant 0 : index
    %c0_12 = arith.constant 0 : index
    %13 = vector.load %arg6[%c0_11, %c0_12] : memref<1x128xf32, #tpu.memory_space<vmem>>, vector<1x128xf32>
    %14 = vector.broadcast %13 : vector<1x128xf32> to vector<16x128xf32>
    %15 = arith.addf %12, %14 : vector<16x128xf32>
    %16 = arith.truncf %15 : vector<16x128xf32> to vector<16x128xbf16>
    %c0_13 = arith.constant 0 : index
    %c0_14 = arith.constant 0 : index
    %17 = vector.load %arg7[%c0_13, %c0_14] : memref<16x128xbf16, #tpu.memory_space<vmem>>, vector<16x128xbf16>
    tpu.vector_store %arg7[%c0_13, %c0_14], %16 {strides = array<i32>} : memref<16x128xbf16, #tpu.memory_space<vmem>>, vector<16x128xbf16>,
    return
  }
  func.func @transform_0(%arg0: i32) -> (i32, i32) {
    %c0_i32 = arith.constant 0 : i32
    %c0_i32_0 = arith.constant 0 : i32
    return %arg0, %c0_i32 : i32, i32
  }
  func.func @transform_1(%arg0: i32) -> (i32, i32) {
    %c0_i32 = arith.constant 0 : i32
    %c0_i32_0 = arith.constant 0 : i32
    return %arg0, %c0_i32 : i32, i32
  }
  func.func @transform_2(%arg0: i32) -> (i32, i32) {
    %c0_i32 = arith.constant 0 : i32
    %c0_i32_0 = arith.constant 0 : i32
    %c0_i32_1 = arith.constant 0 : i32
    return %c0_i32, %c0_i32_0 : i32, i32
  }
  func.func @transform_3(%arg0: i32) -> (i32, i32) {
    %c0_i32 = arith.constant 0 : i32
    %c0_i32_0 = arith.constant 0 : i32
    %c0_i32_1 = arith.constant 0 : i32
    return %c0_i32, %c0_i32_0 : i32, i32
  }
  func.func @transform_4(%arg0: i32) -> (i32, i32) {
    %c0_i32 = arith.constant 0 : i32
    %c0_i32_0 = arith.constant 0 : i32
    %c0_i32_1 = arith.constant 0 : i32
    return %c0_i32, %c0_i32_0 : i32, i32
  }
  func.func @transform_5(%arg0: i32) -> (i32, i32) {
    %c0_i32 = arith.constant 0 : i32
    %c0_i32_0 = arith.constant 0 : i32
    %c0_i32_1 = arith.constant 0 : i32
    return %c0_i32, %c0_i32_0 : i32, i32
  }
  func.func @transform_6(%arg0: i32) -> (i32, i32) {
    %c0_i32 = arith.constant 0 : i32
    %c0_i32_0 = arith.constant 0 : i32
    return %arg0, %c0_i32 : i32, i32
  }
}

</mosaic_0001>

<bundles_post_ra>
// kernel: _inverse_dynamics_pallas.1
= control target key start
LH: loop header
LB: loop body
LE: loop exit
PB: predicated region body
PF: predicated region fallthrough
CT: control target
= control target key end

     0   :  { %v74_v50 = vlaneseq  ;;  %s825_s2 = inlined_call_operand.vmem [shape: bf16[256,256], index: 2, kind: input, shape index: {}]   ;;  %s826_s1 = inlined_call_operand.vmem [shape: bf16[16,128], index: 1, kind: input, shape index: {}]   ;;  %s827_s0 = inlined_call_operand.vmem [shape: bf16[16,128], index: 0, kind: input, shape index: {}]   ;;  %s828_s4 = inlined_call_operand.vmem [shape: bf16[256,128], index: 4, kind: input, shape index: {}]   ;;  %s829_s3 = inlined_call_operand.vmem [shape: f32[1,256], index: 3, kind: input, shape index: {}]   ;;  %s830_s5 = inlined_call_operand.vmem [shape: f32[1,128], index: 5, kind: input, shape index: {}]   ;;  %s831_s6 = inlined_call_operand.vmem [shape: bf16[16,128], index: 6, kind: output, shape index: {}]  }
   0x1   :  { %v565_v0 = vld [vmem:[%s825_s2 + $0x4] ss:$8 sps:$4 sm:$0xff]   ;;  %v567_v1 = vld [vmem:[%s825_s2] ss:$8 sps:$4 sm:$0xff]   ;;  %v568_v2 = vld [vmem:[%s825_s2 + $0x14] ss:$8 sps:$4 sm:$0xff]  }
   0x2   :  { %244 = vmatprep.subr.bf16.mxu0 %v565_v0  ;;  %v570_v3 = vld [vmem:[%s825_s2 + $0x10] ss:$8 sps:$4 sm:$0xff]   ;;  %v571_v4 = vld [vmem:[%s825_s2 + $0x24] ss:$8 sps:$4 sm:$0xff]   ;;  %v573_v5 = vld [vmem:[%s825_s2 + $0x20] ss:$8 sps:$4 sm:$0xff]  }
   0x3   :  { %245 = vmatpush1.bf16.msra.mxu0 %v567_v1  ;;  %v574_v6 = vld [vmem:[%s825_s2 + $0x34] ss:$8 sps:$4 sm:$0xff]   ;;  %v576_v7 = vld [vmem:[%s825_s2 + $0x30] ss:$8 sps:$4 sm:$0xff]   ;;  %v577_v8 = vld [vmem:[%s825_s2 + $0x44] ss:$8 sps:$4 sm:$0xff]  }
   0x4   :  { %246 = vmatprep.subr.bf16.mxu0 %v568_v2  ;;  %v579_v9 = vld [vmem:[%s825_s2 + $0x40] ss:$8 sps:$4 sm:$0xff]   ;;  %v580_v10 = vld [vmem:[%s825_s2 + $0x54] ss:$8 sps:$4 sm:$0xff]   ;;  %v582_v11 = vld [vmem:[%s825_s2 + $0x50] ss:$8 sps:$4 sm:$0xff]  }
   0x5   :  { %v583_v12 = vld [vmem:[%s825_s2 + $0x64] ss:$8 sps:$4 sm:$0xff]   ;;  %v585_v13 = vld [vmem:[%s825_s2 + $0x60] ss:$8 sps:$4 sm:$0xff]   ;;  %v586_v15 = vld [vmem:[%s825_s2 + $0x74] ss:$8 sps:$4 sm:$0xff]  }
   0x6   :  { %v613_v14 = vld [vmem:[%s826_s1] sm:$0xff]   ;;  %v588_v17 = vld [vmem:[%s825_s2 + $0x70] ss:$8 sps:$4 sm:$0xff]   ;;  %v617_v20 = vld [vmem:[%s828_s4 + $0x48] sm:$0xff]   ;;  %v75_v51 = vshrl.u32 %v74_v50, 7 }
   0x7   :  { %247 = vmatpush1.bf16.msra.mxu0 %v570_v3  ;;  %276 = vmatprep.mubr.bf16.mxu0 %v613_v14  ;;  %v615_v16 = vld [vmem:[%s828_s4 + $0x40] sm:$0xff]   ;;  %v618_v21 = vld [vmem:[%s828_s4 + $0x8] sm:$0xff]   ;;  %v619_v22 = vld [vmem:[%s828_s4 + $0x50] sm:$0xff]  }
   0x8   :  { %248 = vmatprep.subr.bf16.mxu0 %v571_v4  ;;  %v616_v18 = vld [vmem:[%s828_s4] sm:$0xff]   ;;  %543 = vmatprep.subr.bf16.mxu1 %v615_v16  ;;  %v592_v24 = vld [vmem:[%s825_s2 + $0x94] ss:$8 sps:$4 sm:$0xff]   ;;  %v594_v27 = vld [vmem:[%s825_s2 + $0x90] ss:$8 sps:$4 sm:$0xff]   ;;  %v76_v52 = vsub.s32 0, %v75_v51 }
   0x9   :  { %v589_v19 = vld [vmem:[%s825_s2 + $0x84] ss:$8 sps:$4 sm:$0xff]   ;;  %544 = vmatpush3.bf16.msra.mxu1 %v616_v18  ;;  %v591_v23 = vld [vmem:[%s825_s2 + $0x80] ss:$8 sps:$4 sm:$0xff]   ;;  %v620_v25 = vld [vmem:[%s828_s4 + $0x10] sm:$0xff]   ;;  %v80_v54 = vsub.s32 1, %v75_v51 }
   0xa   :  { %545 = vmatprep.subr.bf16.mxu1 %v617_v20  ;;  %v621_v26 = vld [vmem:[%s828_s4 + $0x58] sm:$0xff]   ;;  %v595_v28 = vld [vmem:[%s825_s2 + $0xa4] ss:$8 sps:$4 sm:$0xff]   ;;  %v597_v31 = vld [vmem:[%s825_s2 + $0xa0] ss:$8 sps:$4 sm:$0xff]  }
   0xb   :  { %249 = vmatpush1.bf16.msra.mxu0 %v573_v5  ;;  %v622_v29 = vld [vmem:[%s828_s4 + $0x18] sm:$0xff]   ;;  %v623_v30 = vld [vmem:[%s828_s4 + $0x60] sm:$0xff]   ;;  %v625_v34 = vld [vmem:[%s828_s4 + $0x68] sm:$0xff]  }
   0xc   :  { %250 = vmatprep.subr.bf16.mxu0 %v574_v6  ;;  %v624_v32 = vld [vmem:[%s828_s4 + $0x20] sm:$0xff]   ;;  %v598_v33 = vld [vmem:[%s825_s2 + $0xb4] ss:$8 sps:$4 sm:$0xff]   ;;  %v600_v35 = vld [vmem:[%s825_s2 + $0xb0] ss:$8 sps:$4 sm:$0xff]  }
   0xd   :  { %546 = vmatpush3.bf16.msra.mxu1 %v618_v21  ;;  %v601_v36 = vld [vmem:[%s825_s2 + $0xc4] ss:$8 sps:$4 sm:$0xff]   ;;  %v603_v37 = vld [vmem:[%s825_s2 + $0xc0] ss:$8 sps:$4 sm:$0xff]   ;;  %v604_v38 = vld [vmem:[%s825_s2 + $0xd4] ss:$8 sps:$4 sm:$0xff]  }
   0xe   :  { %547 = vmatprep.subr.bf16.mxu1 %v619_v22  ;;  %v606_v39 = vld [vmem:[%s825_s2 + $0xd0] ss:$8 sps:$4 sm:$0xff]   ;;  %v607_v40 = vld [vmem:[%s825_s2 + $0xe4] ss:$8 sps:$4 sm:$0xff]   ;;  %v609_v41 = vld [vmem:[%s825_s2 + $0xe0] ss:$8 sps:$4 sm:$0xff]  }
   0xf   :  { %251 = vmatpush1.bf16.msra.mxu0 %v576_v7  ;;  %v610_v42 = vld [vmem:[%s825_s2 + $0xf4] ss:$8 sps:$4 sm:$0xff]   ;;  %v612_v43 = vld [vmem:[%s825_s2 + $0xf0] ss:$8 sps:$4 sm:$0xff]   ;;  %v614_v44 = vld [vmem:[%s827_s0] sm:$0xff]  }
  0x10   :  { %252 = vmatprep.subr.bf16.mxu0 %v577_v8  ;;  %v626_v45 = vld [vmem:[%s828_s4 + $0x28] sm:$0xff]   ;;  %v627_v46 = vld [vmem:[%s828_s4 + $0x70] sm:$0xff]   ;;  %v629_v48 = vld [vmem:[%s828_s4 + $0x78] sm:$0xff]  }
  0x11   :  { %548 = vmatpush3.bf16.msra.mxu1 %v620_v25  ;;  %v628_v47 = vld [vmem:[%s828_s4 + $0x30] sm:$0xff]   ;;  %v630_v49 = vld [vmem:[%s828_s4 + $0x38] sm:$0xff]   ;;  %v72_v53 = vld [vmem:[%s829_s3] sm:$0x3] }
  0x12   :  { %549 = vmatprep.subr.bf16.mxu1 %v621_v26  ;;  %v77_v55 = vrot.slane %v72_v53, %v76_v52  ;;  %v81_v56 = vrot.slane %v72_v53, %v80_v54 }
  0x13   :  { %253 = vmatpush1.bf16.msra.mxu0 %v579_v9 }
  0x14   :  { %254 = vmatprep.subr.bf16.mxu0 %v580_v10 }
  0x15   :  { %550 = vmatpush3.bf16.msra.mxu1 %v622_v29 }
  0x16   :  { %551 = vmatprep.subr.bf16.mxu1 %v623_v30 }
  0x17   :  { %255 = vmatpush1.bf16.msra.mxu0 %v582_v11  ;;  %v517_v11 = vld [vmem:[%s830_s5] ss:$0 sm:$0xff] }
  0x18   :  { %256 = vmatprep.subr.bf16.mxu0 %v583_v12 }
  0x19   :  { %552 = vmatpush3.bf16.msra.mxu1 %v624_v32 }
  0x1a   :  { %553 = vmatprep.subr.bf16.mxu1 %v625_v34 }
  0x1b   :  { %257 = vmatpush1.bf16.msra.mxu0 %v585_v13 }
  0x1c   :  { %258 = vmatprep.subr.bf16.mxu0 %v586_v15 }
  0x1d   :  { %554 = vmatpush3.bf16.msra.mxu1 %v626_v45 }
  0x1e   :  { %555 = vmatprep.subr.bf16.mxu1 %v627_v46 }
  0x1f   :  { %259 = vmatpush1.bf16.msra.mxu0 %v588_v17 }
  0x20   :  { %260 = vmatprep.subr.bf16.mxu0 %v589_v19 }
  0x21   :  { %556 = vmatpush3.bf16.msra.mxu1 %v628_v47 }
  0x22   :  { %557 = vmatprep.subr.bf16.mxu1 %v629_v48 }
  0x23   :  { %261 = vmatpush1.bf16.msra.mxu0 %v591_v23 }
  0x24   :  { %262 = vmatprep.subr.bf16.mxu0 %v592_v24 }
  0x25   :  { %558 = vmatpush3.bf16.msra.mxu1 %v630_v49 }
  0x27   :  { %263 = vmatpush1.bf16.msra.mxu0 %v594_v27 }
  0x28   :  { %264 = vmatprep.subr.bf16.mxu0 %v595_v28 }
  0x2b   :  { %265 = vmatpush1.bf16.msra.mxu0 %v597_v31 }
  0x2c   :  { %266 = vmatprep.subr.bf16.mxu0 %v598_v33 }
  0x2f   :  { %267 = vmatpush1.bf16.msra.mxu0 %v600_v35 }
  0x30   :  { %268 = vmatprep.subr.bf16.mxu0 %v601_v36 }
  0x33   :  { %269 = vmatpush1.bf16.msra.mxu0 %v603_v37 }
  0x34   :  { %270 = vmatprep.subr.bf16.mxu0 %v604_v38 }
  0x37   :  { %271 = vmatpush1.bf16.msra.mxu0 %v606_v39 }
  0x38   :  { %272 = vmatprep.subr.bf16.mxu0 %v607_v40 }
  0x3b   :  { %273 = vmatpush1.bf16.msra.mxu0 %v609_v41 }
  0x3c   :  { %274 = vmatprep.subr.bf16.mxu0 %v610_v42 }
  0x3f   :  { %275 = vmatpush1.bf16.msra.mxu0 %v612_v43 }
  0x42   :  { %277 = vmatmul.mubr.bf16.vlgmr.msra.gmra.mrb[0].mxu0 %v614_v44 }
 0x115   :  { %v278_v57 = vpop.f32.mrb[0].mxu0 }
 0x116   :  { %v279_v58 = vadd.f32 %v278_v57, %v77_v55  ;;  %v280_v59 = vpop.f32.mrb[1].mxu0 }
 0x117   :  { %v281_v60 = vadd.f32 %v280_v59, %v81_v56  ;;  %v282_v61 = vpop.f32.mrb[2].mxu0 }
 0x118   :  { %v283_v62 = vadd.f32 %v282_v61, %v77_v55  ;;  %v284_v63 = vpop.f32.mrb[3].mxu0  ;;  %v287_v1 = vmax.f32 %v279_v58, 0.0 }
 0x119   :  { %v285_v0 = vadd.f32 %v284_v63, %v81_v56  ;;  %v288_v3 = vmax.f32 %v281_v60, 0.0 }
 0x11a   :  { %v289_v2 = vmax.f32 %v283_v62, 0.0 }
 0x11b   :  { %v290_v4 = vmax.f32 %v285_v0, 0.0 }
 0x11c   :  { %v291_v5 = vpack.c.bf16 %v289_v2, %v287_v1 }
 0x11d   :  { %v292_v6 = vpack.c.bf16 %v290_v4, %v288_v3 }
 0x11f   :  { %460 = vmatprep.mubr.bf16.mxu1 %v292_v6 }
 0x120   :  { %461 = vmatmul.mubr.bf16.vlgmr.msra.gmra.mrb[0].mxu1 %v291_v5 }
 0x1f3   :  { %v559_v7 = vpop.f32.mrb[0].mxu1 }
 0x1f4   :  { %v560_v8 = vpop.f32.mrb[1].mxu1 }
 0x1f5   :  { %v561_v9 = vadd.f32 %v560_v8, %v559_v7  ;;  %v562_v10 = vpop.f32.mrb[2].mxu1 }
 0x1f6   :  { %v563_v12 = vpop.f32.mrb[3].mxu1 }
 0x1f7   :  { %v564_v13 = vadd.f32 %v563_v12, %v562_v10  ;;  %v463_v14 = vadd.f32 %v561_v9, %v517_v11 }
 0x1f9   :  { %v466_v15 = vadd.f32 %v564_v13, %v517_v11 }
 0x1fb   :  { %v541_v16 = vpack.c.bf16 %v466_v15, %v463_v14 }
 0x1fd   :  { %542 = vst [vmem:[%s831_s6] sm:$0xff] %v541_v16  }

</bundles_post_ra>
